<compile_context>
chip_gen: v5e
topology: v5e:2x2
jax: 0.10.0
libtpu: 0.0.40
codegen_flags: <defaults>
</compile_context>

<pallas_src>
import jax
import jax.numpy as jnp
from jax.experimental import pallas as pl
from jax.experimental.pallas import tpu as pltpu

LANE = 128      # TPU lane width: every feature dim is padded to a multiple of this
TILE_B = 128    # batch rows per grid step (batch is zero-padded up to a multiple)
N_OUT = 2       # real number of logits (fc3 out_features)


def _round_up(n, m):
    return ((n + m - 1) // m) * m


def entity_matcher_kernel(x_ref, w1_ref, c1_ref, w2_ref, c2_ref, w3_ref, b3_ref, o_ref):
    # fc1 (+ folded bn1) + relu ; dropout1 = identity (eval)
    h1 = jnp.dot(x_ref[...], w1_ref[...], preferred_element_type=jnp.float32)
    h1 = jnp.maximum(h1 + c1_ref[...], 0.0).astype(jnp.bfloat16)
    # fc2 (+ folded bn2) + relu ; dropout2 = identity (eval)
    h2 = jnp.dot(h1, w2_ref[...], preferred_element_type=jnp.float32)
    h2 = jnp.maximum(h2 + c2_ref[...], 0.0).astype(jnp.bfloat16)
    # fc3 -> lane-dense 128-wide output slab (real logits live in columns [:2])
    o_ref[...] = jnp.dot(h2, w3_ref[...], preferred_element_type=jnp.float32) + b3_ref[...]


@jax.jit
def entity_matcher_forward(x, params):
    w1, c1, w2, c2, w3, b3 = params
    B, d_in = x.shape
    d_in_p, h1_p = w1.shape
    h2_p = w2.shape[1]
    out_p = w3.shape[1]

    # Pad batch to a multiple of TILE_B and features to the padded input width.
    b_p = _round_up(B, TILE_B)
    xp = jnp.zeros((b_p, d_in_p), jnp.bfloat16).at[:B, :d_in].set(x.astype(jnp.bfloat16))

    grid = (b_p // TILE_B,)
    const = lambda i: (0, 0)   # weights / biases stay resident in VMEM across steps

    flops = 2 * b_p * (d_in_p * h1_p + h1_p * h2_p + h2_p * out_p)
    bytes_accessed = (
        xp.size * 2                                   # streamed activations (bf16)
        + (w1.size + w2.size + w3.size) * 2           # bf16 weights
        + (c1.size + c2.size + b3.size) * 4           # f32 biases
        + b_p * out_p * 4                             # f32 output slab
    )

    out = pl.pallas_call(
        entity_matcher_kernel,
        out_shape=jax.ShapeDtypeStruct((b_p, out_p), jnp.float32),
        grid_spec=pltpu.PrefetchScalarGridSpec(
            num_scalar_prefetch=0,
            grid=grid,
            in_specs=[
                pl.BlockSpec((TILE_B, d_in_p), lambda i: (i, 0)),  # x tile streams
                pl.BlockSpec((d_in_p, h1_p), const),               # w1 resident
                pl.BlockSpec((1, h1_p), const),                    # bias1 resident
                pl.BlockSpec((h1_p, h2_p), const),                 # w2 resident
                pl.BlockSpec((1, h2_p), const),                    # bias2 resident
                pl.BlockSpec((h2_p, out_p), const),                # w3 resident
                pl.BlockSpec((1, out_p), const),                   # b3 resident
            ],
            out_specs=pl.BlockSpec((TILE_B, out_p), lambda i: (i, 0)),
        ),
        compiler_params=pltpu.CompilerParams(
            dimension_semantics=("parallel",),          # shard batch tiles over TCs (v7x)
            vmem_limit_bytes=64 * 1024 * 1024,          # headroom for full-size (6144/1024) weights
        ),
        cost_estimate=pl.CostEstimate(
            flops=flops, transcendentals=0, bytes_accessed=bytes_accessed),
    )(xp, w1, c1, w2, c2, w3, b3)

    return out[:B, :N_OUT]


def make_params(key, input_dim, hidden_dim, eps=1e-5):
    """Deterministic synthetic parameters.

    BatchNorm1d (running stats, eval mode) is folded into the linear weights/bias:
        bn(x @ W.T + b) = x @ (W.T * s) + (s*b + beta - s*mean),  s = gamma / sqrt(var + eps)
    Weights are lane-padded to multiples of 128 and cast to bf16; biases stay f32.
    Returns (kernel_params, raw_f32_params_for_reference).
    """
    h2_dim = hidden_dim // 2
    ks = jax.random.split(key, 12)

    def lin(kw, kb, d_in, d_out):
        bound = 1.0 / jnp.sqrt(d_in)
        w = jax.random.uniform(kw, (d_out, d_in), jnp.float32, -bound, bound)
        b = jax.random.uniform(kb, (d_out,), jnp.float32, -bound, bound)
        return w, b

    w1, b1 = lin(ks[0], ks[1], input_dim, hidden_dim)
    w2, b2 = lin(ks[2], ks[3], hidden_dim, h2_dim)
    w3, b3 = lin(ks[4], ks[5], h2_dim, N_OUT)

    g1 = jax.random.uniform(ks[6], (hidden_dim,), jnp.float32, 0.5, 1.5)
    be1 = jax.random.uniform(ks[7], (hidden_dim,), jnp.float32, -0.5, 0.5)
    m1 = jax.random.normal(ks[8], (hidden_dim,)) * 0.1
    v1 = jnp.abs(jax.random.normal(ks[9], (hidden_dim,))) * 0.1 + 1.0

    g2 = jax.random.uniform(ks[10], (h2_dim,), jnp.float32, 0.5, 1.5)
    be2 = jax.random.uniform(ks[11], (h2_dim,), jnp.float32, -0.5, 0.5)
    m2 = jnp.zeros((h2_dim,), jnp.float32)
    v2 = jnp.ones((h2_dim,), jnp.float32)

    raw = dict(w1=w1, b1=b1, g1=g1, be1=be1, m1=m1, v1=v1,
               w2=w2, b2=b2, g2=g2, be2=be2, m2=m2, v2=v2,
               w3=w3, b3=b3, eps=eps)

    # BN fold.
    s1 = g1 / jnp.sqrt(v1 + eps)
    c1 = s1 * b1 + be1 - s1 * m1
    s2 = g2 / jnp.sqrt(v2 + eps)
    c2 = s2 * b2 + be2 - s2 * m2

    w1f = w1.T * s1[None, :]   # (input_dim, hidden)
    w2f = w2.T * s2[None, :]   # (hidden, hidden//2)
    w3f = w3.T                 # (hidden//2, 2)

    # Lane padding (zero rows/cols + zero biases are exact no-ops through relu/matmul).
    d_in_p = _round_up(input_dim, LANE)
    h1_p = _round_up(hidden_dim, LANE)
    h2_p = _round_up(h2_dim, LANE)
    out_p = LANE  # pad 2-wide fc3 output to a full lane slab

    def pad2(a, r, c):
        return jnp.zeros((r, c), a.dtype).at[:a.shape[0], :a.shape[1]].set(a)

    params = (
        pad2(w1f, d_in_p, h1_p).astype(jnp.bfloat16),
        pad2(c1[None, :], 1, h1_p),
        pad2(w2f, h1_p, h2_p).astype(jnp.bfloat16),
        pad2(c2[None, :], 1, h2_p),
        pad2(w3f, h2_p, out_p).astype(jnp.bfloat16),
        pad2(b3[None, :], 1, out_p),
    )
    return params, raw


def reference_forward(x, params):
    """Pure-JAX reference following the exact same folded/padded/bf16 numeric path."""
    w1, c1, w2, c2, w3, b3 = params
    xb = jnp.zeros((x.shape[0], w1.shape[0]), jnp.bfloat16).at[:, :x.shape[1]].set(
        x.astype(jnp.bfloat16))
    h1 = jnp.maximum(jnp.dot(xb, w1, preferred_element_type=jnp.float32) + c1, 0.0)
    h1 = h1.astype(jnp.bfloat16)
    h2 = jnp.maximum(jnp.dot(h1, w2, preferred_element_type=jnp.float32) + c2, 0.0)
    h2 = h2.astype(jnp.bfloat16)
    out = jnp.dot(h2, w3, preferred_element_type=jnp.float32) + b3
    return out[:, :N_OUT]


def reference_module_f32(x, raw):
    """Float32 reference of the original module (fc->bn(eval)->relu->dropout(eval)->... )."""
    def bn(h, g, be, m, v, eps):
        return (h - m) / jnp.sqrt(v + eps) * g + be
    h = x @ raw["w1"].T + raw["b1"]
    h = jnp.maximum(bn(h, raw["g1"], raw["be1"], raw["m1"], raw["v1"], raw["eps"]), 0.0)
    h = h @ raw["w2"].T + raw["b2"]
    h = jnp.maximum(bn(h, raw["g2"], raw["be2"], raw["m2"], raw["v2"], raw["eps"]), 0.0)
    return h @ raw["w3"].T + raw["b3"]


if __name__ == "__main__":
    # Small shapes consistent with the module structure (input_dim, hidden, hidden//2, 2)
    B, INPUT_DIM, HIDDEN_DIM = 16, 256, 64

    key = jax.random.PRNGKey(0)
    k_x, k_p = jax.random.split(key)
    x = jax.random.normal(k_x, (B, INPUT_DIM), dtype=jnp.float32)
    params, raw = make_params(k_p, INPUT_DIM, HIDDEN_DIM)

    out = entity_matcher_forward(x, params)
    out = jax.block_until_ready(out)
    assert out.shape == (B, N_OUT)

    # Exact-path reference (same bf16 rounding points, f32 accumulation).
    ref = reference_forward(x, params)
    assert jnp.allclose(out, ref, atol=1e-3, rtol=1e-3), \
        float(jnp.max(jnp.abs(out - ref)))

    # Loose check against the unfolded float32 module semantics (bf16 quantization noise only).
    ref32 = reference_module_f32(x, raw)
    assert jnp.allclose(out, ref32, atol=1e-1, rtol=1e-1), \
        float(jnp.max(jnp.abs(out - ref32)))

    print("KERNEL_OK")
</pallas_src>

<mosaic_0001>
module attributes {stable_mosaic.version = 11 : i64} {
  func.func @entity_matcher_kernel(%arg0: i32, %arg1: memref<128x256xbf16, #tpu.memory_space<vmem>>, %arg2: memref<256x128xbf16, #tpu.memory_space<vmem>>, %arg3: memref<1x128xf32, #tpu.memory_space<vmem>>, %arg4: memref<128x128xbf16, #tpu.memory_space<vmem>>, %arg5: memref<1x128xf32, #tpu.memory_space<vmem>>, %arg6: memref<128x128xbf16, #tpu.memory_space<vmem>>, %arg7: memref<1x128xf32, #tpu.memory_space<vmem>>, %arg8: memref<128x128xf32, #tpu.memory_space<vmem>>) attributes {dimension_semantics = [#tpu.dimension_semantics<parallel>], iteration_bounds = array<i64: 1>, scalar_prefetch = 0 : i64, scratch_operands = 0 : i64, tpu.core_type = #tpu.core_type<tc>, window_params = [{transform_indices = @transform_0, window_bounds = array<i64: 128, 256>}, {pipeline_mode = #tpu.pipeline_mode<synchronous>, transform_indices = @transform_1, window_bounds = array<i64: 256, 128>}, {pipeline_mode = #tpu.pipeline_mode<synchronous>, transform_indices = @transform_2, window_bounds = array<i64: 1, 128>}, {pipeline_mode = #tpu.pipeline_mode<synchronous>, transform_indices = @transform_3, window_bounds = array<i64: 128, 128>}, {pipeline_mode = #tpu.pipeline_mode<synchronous>, transform_indices = @transform_4, window_bounds = array<i64: 1, 128>}, {pipeline_mode = #tpu.pipeline_mode<synchronous>, transform_indices = @transform_5, window_bounds = array<i64: 128, 128>}, {pipeline_mode = #tpu.pipeline_mode<synchronous>, transform_indices = @transform_6, window_bounds = array<i64: 1, 128>}, {transform_indices = @transform_7, window_bounds = array<i64: 128, 128>}]} {
    %c0 = arith.constant 0 : index
    %c0_0 = arith.constant 0 : index
    %0 = vector.load %arg1[%c0, %c0_0] : memref<128x256xbf16, #tpu.memory_space<vmem>>, vector<128x256xbf16>
    %c0_1 = arith.constant 0 : index
    %c0_2 = arith.constant 0 : index
    %1 = vector.load %arg2[%c0_1, %c0_2] : memref<256x128xbf16, #tpu.memory_space<vmem>>, vector<256x128xbf16>
    %cst = arith.constant dense<0.000000e+00> : vector<128x128xf32>
    %2 = tpu.matmul %0, %1, %cst {dimension_numbers = #tpu.dot_dimension_numbers<[1], [0], [0], [1], [0, 0, 1, 1], [], []>} : vector<128x256xbf16>, vector<256x128xbf16>, vector<128x128xf32> -> vector<128x128xf32>
    %c0_3 = arith.constant 0 : index
    %c0_4 = arith.constant 0 : index
    %3 = vector.load %arg3[%c0_3, %c0_4] : memref<1x128xf32, #tpu.memory_space<vmem>>, vector<1x128xf32>
    %4 = vector.broadcast %3 : vector<1x128xf32> to vector<128x128xf32>
    %5 = arith.addf %2, %4 : vector<128x128xf32>
    %cst_5 = arith.constant 0.000000e+00 : f32
    %6 = vector.broadcast %cst_5 : f32 to vector<128x128xf32>
    %7 = arith.maximumf %5, %6 : vector<128x128xf32>
    %8 = arith.truncf %7 : vector<128x128xf32> to vector<128x128xbf16>
    %c0_6 = arith.constant 0 : index
    %c0_7 = arith.constant 0 : index
    %9 = vector.load %arg4[%c0_6, %c0_7] : memref<128x128xbf16, #tpu.memory_space<vmem>>, vector<128x128xbf16>
    %cst_8 = arith.constant dense<0.000000e+00> : vector<128x128xf32>
    %10 = tpu.matmul %8, %9, %cst_8 {dimension_numbers = #tpu.dot_dimension_numbers<[1], [0], [0], [1], [0, 0, 1, 1], [], []>} : vector<128x128xbf16>, vector<128x128xbf16>, vector<128x128xf32> -> vector<128x128xf32>
    %c0_9 = arith.constant 0 : index
    %c0_10 = arith.constant 0 : index
    %11 = vector.load %arg5[%c0_9, %c0_10] : memref<1x128xf32, #tpu.memory_space<vmem>>, vector<1x128xf32>
    %12 = vector.broadcast %11 : vector<1x128xf32> to vector<128x128xf32>
    %13 = arith.addf %10, %12 : vector<128x128xf32>
    %cst_11 = arith.constant 0.000000e+00 : f32
    %14 = vector.broadcast %cst_11 : f32 to vector<128x128xf32>
    %15 = arith.maximumf %13, %14 : vector<128x128xf32>
    %16 = arith.truncf %15 : vector<128x128xf32> to vector<128x128xbf16>
    %c0_12 = arith.constant 0 : index
    %c0_13 = arith.constant 0 : index
    %17 = vector.load %arg6[%c0_12, %c0_13] : memref<128x128xbf16, #tpu.memory_space<vmem>>, vector<128x128xbf16>
    %cst_14 = arith.constant dense<0.000000e+00> : vector<128x128xf32>
    %18 = tpu.matmul %16, %17, %cst_14 {dimension_numbers = #tpu.dot_dimension_numbers<[1], [0], [0], [1], [0, 0, 1, 1], [], []>} : vector<128x128xbf16>, vector<128x128xbf16>, vector<128x128xf32> -> vector<128x128xf32>
    %c0_15 = arith.constant 0 : index
    %c0_16 = arith.constant 0 : index
    %19 = vector.load %arg7[%c0_15, %c0_16] : memref<1x128xf32, #tpu.memory_space<vmem>>, vector<1x128xf32>
    %20 = vector.broadcast %19 : vector<1x128xf32> to vector<128x128xf32>
    %21 = arith.addf %18, %20 : vector<128x128xf32>
    %c0_17 = arith.constant 0 : index
    %c0_18 = arith.constant 0 : index
    %22 = vector.load %arg8[%c0_17, %c0_18] : memref<128x128xf32, #tpu.memory_space<vmem>>, vector<128x128xf32>
    tpu.vector_store %arg8[%c0_17, %c0_18], %21 {strides = array<i32>} : memref<128x128xf32, #tpu.memory_space<vmem>>, vector<128x128xf32>,
    return
  }
  func.func @transform_0(%arg0: i32) -> (i32, i32) {
    %c0_i32 = arith.constant 0 : i32
    %c0_i32_0 = arith.constant 0 : i32
    return %arg0, %c0_i32 : i32, i32
  }
  func.func @transform_1(%arg0: i32) -> (i32, i32) {
    %c0_i32 = arith.constant 0 : i32
    %c0_i32_0 = arith.constant 0 : i32
    %c0_i32_1 = arith.constant 0 : i32
    return %c0_i32, %c0_i32_0 : i32, i32
  }
  func.func @transform_2(%arg0: i32) -> (i32, i32) {
    %c0_i32 = arith.constant 0 : i32
    %c0_i32_0 = arith.constant 0 : i32
    %c0_i32_1 = arith.constant 0 : i32
    return %c0_i32, %c0_i32_0 : i32, i32
  }
  func.func @transform_3(%arg0: i32) -> (i32, i32) {
    %c0_i32 = arith.constant 0 : i32
    %c0_i32_0 = arith.constant 0 : i32
    %c0_i32_1 = arith.constant 0 : i32
    return %c0_i32, %c0_i32_0 : i32, i32
  }
  func.func @transform_4(%arg0: i32) -> (i32, i32) {
    %c0_i32 = arith.constant 0 : i32
    %c0_i32_0 = arith.constant 0 : i32
    %c0_i32_1 = arith.constant 0 : i32
    return %c0_i32, %c0_i32_0 : i32, i32
  }
  func.func @transform_5(%arg0: i32) -> (i32, i32) {
    %c0_i32 = arith.constant 0 : i32
    %c0_i32_0 = arith.constant 0 : i32
    %c0_i32_1 = arith.constant 0 : i32
    return %c0_i32, %c0_i32_0 : i32, i32
  }
  func.func @transform_6(%arg0: i32) -> (i32, i32) {
    %c0_i32 = arith.constant 0 : i32
    %c0_i32_0 = arith.constant 0 : i32
    %c0_i32_1 = arith.constant 0 : i32
    return %c0_i32, %c0_i32_0 : i32, i32
  }
  func.func @transform_7(%arg0: i32) -> (i32, i32) {
    %c0_i32 = arith.constant 0 : i32
    %c0_i32_0 = arith.constant 0 : i32
    return %arg0, %c0_i32 : i32, i32
  }
}

</mosaic_0001>

<bundles_post_ra>
// kernel: entity_matcher_forward.1
= control target key start
LH: loop header
LB: loop body
LE: loop exit
PB: predicated region body
PF: predicated region fallthrough
CT: control target
= control target key end

     0   :  { %12 = vsyncpa [#allocation3], 0  ;;  %s943_s27 = smov [#allocation2]   ;;  %s944_s29 = smov 64   ;;  %s1232_s0 = inlined_call_operand.vmem [shape: bf16[128,256], index: 0, kind: input, shape index: {}]   ;;  %s1233_s1 = inlined_call_operand.vmem [shape: bf16[256,128], index: 1, kind: input, shape index: {}]   ;;  %s1234_s2 = inlined_call_operand.vmem [shape: f32[1,128], index: 2, kind: input, shape index: {}]   ;;  %s1235_s3 = inlined_call_operand.vmem [shape: bf16[128,128], index: 3, kind: input, shape index: {}]   ;;  %s1236_s4 = inlined_call_operand.vmem [shape: f32[1,128], index: 4, kind: input, shape index: {}]   ;;  %s1237_s5 = inlined_call_operand.hbm [shape: bf16[128,128], index: 5, kind: input, shape index: {}]   ;;  %s1238_s6 = inlined_call_operand.vmem [shape: f32[1,128], index: 6, kind: input, shape index: {}]   ;;  %s1239_s7 = inlined_call_operand.vmem [shape: f32[128,128], index: 7, kind: output, shape index: {}]  }
   0x1   :  { %s27_s26 = sshll.u32 %s1237_s5, 4  ;;  %s29_s28 = sshll.u32 %s943_s27, 4  ;;  %s28_s26 = int_to_ptr.hbm [resolvable:$true] %s27_s26  ;;  %s30_s28 = int_to_ptr.vmem [resolvable:$true] %s29_s28 }
   0x2   :  { %s945_s30 = smov 4  }
   0x3   :  { %35 = dma.hbm_to_vmem [thread:$0]  %s28_s26, 1024, %s30_s28, [#allocation3], %s944_s29, %s944_s29, %s945_s30  }
   0x4   :  { %941 = dma.done.wait [#allocation3], 1024  }
   0x5   :  { %942 = vsyncadd [#allocation3], 4294966272  ;;  %v886_v0 = vld [vmem:[%s1233_s1 + $0x38] sm:$0xff]  ;;  %v885_v2 = vld [vmem:[%s1233_s1 + $0x30] sm:$0xff] }
   0x6   :  { %v894_v1 = vld [vmem:[%s1233_s1 + $0x78] sm:$0xff]  ;;  %270 = vmatpush.bf16.msra.mxu0 %v886_v0  ;;  %v893_v3 = vld [vmem:[%s1233_s1 + $0x70] sm:$0xff]  ;;  %v884_v4 = vld [vmem:[%s1233_s1 + $0x28] sm:$0xff] }
   0x7   :  { %319 = vmatpush.bf16.msra.mxu1 %v894_v1  ;;  %v892_v5 = vld [vmem:[%s1233_s1 + $0x68] sm:$0xff]  ;;  %v883_v6 = vld [vmem:[%s1233_s1 + $0x20] sm:$0xff]  ;;  %v882_v8 = vld [vmem:[%s1233_s1 + $0x18] sm:$0xff] }
   0x8   :  { %v891_v7 = vld [vmem:[%s1233_s1 + $0x60] sm:$0xff]  ;;  %v890_v9 = vld [vmem:[%s1233_s1 + $0x58] sm:$0xff]  ;;  %v881_v10 = vld [vmem:[%s1233_s1 + $0x10] sm:$0xff] }
   0x9   :  { %v889_v11 = vld [vmem:[%s1233_s1 + $0x50] sm:$0xff]  ;;  %v880_v12 = vld [vmem:[%s1233_s1 + $0x8] sm:$0xff]  ;;  %v879_v14 = vld [vmem:[%s1233_s1] sm:$0xff] }
   0xa   :  { %271 = vmatpush.bf16.msra.mxu0 %v885_v2  ;;  %v888_v13 = vld [vmem:[%s1233_s1 + $0x48] sm:$0xff]  ;;  %v887_v15 = vld [vmem:[%s1233_s1 + $0x40] sm:$0xff]  ;;  %v681_v22 = vld [vmem:[%s1232_s0 + $0x10] sm:$0xf] }
   0xb   :  { %320 = vmatpush.bf16.msra.mxu1 %v893_v3  ;;  %v673_v16 = vld [vmem:[%s1232_s0] sm:$0xf]  ;;  %v864_v17 = vld [vmem:[%s1232_s0 + $0x4] sm:$0xf0]  ;;  %v863_v18 = vld [vmem:[%s1232_s0 + $0x4] sm:$0xf] }
   0xc   :  { %v675_v19 = vld [vmem:[%s1232_s0 + $0x8] sm:$0xf0]  ;;  %v674_v20 = vor.u32 %v864_v17, %v673_v16  ;;  %v866_v23 = vld [vmem:[%s1232_s0 + $0x14] sm:$0xf0]  ;;  %v865_v24 = vld [vmem:[%s1232_s0 + $0x14] sm:$0xf] }
   0xd   :  { %v678_v21 = vor.u32 %v863_v18, %v675_v19  ;;  %v683_v25 = vld [vmem:[%s1232_s0 + $0x18] sm:$0xf0]  ;;  %v682_v26 = vor.u32 %v866_v23, %v681_v22  ;;  %v689_v28 = vld [vmem:[%s1232_s0 + $0x20] sm:$0xf]  ;;  %v868_v29 = vld [vmem:[%s1232_s0 + $0x24] sm:$0xf0] }
   0xe   :  { %272 = vmatpush.bf16.msra.mxu0 %v884_v4  ;;  %v686_v27 = vor.u32 %v865_v24, %v683_v25  ;;  %v867_v30 = vld [vmem:[%s1232_s0 + $0x24] sm:$0xf]  ;;  %v691_v31 = vld [vmem:[%s1232_s0 + $0x28] sm:$0xf0]  ;;  %v690_v32 = vor.u32 %v868_v29, %v689_v28  ;;  %v697_v34 = vld [vmem:[%s1232_s0 + $0x30] sm:$0xf] }
   0xf   :  { %321 = vmatpush.bf16.msra.mxu1 %v892_v5  ;;  %v694_v33 = vor.u32 %v867_v30, %v691_v31  ;;  %v870_v35 = vld [vmem:[%s1232_s0 + $0x34] sm:$0xf0]  ;;  %v869_v36 = vld [vmem:[%s1232_s0 + $0x34] sm:$0xf]  ;;  %v699_v37 = vld [vmem:[%s1232_s0 + $0x38] sm:$0xf0] }
  0x10   :  { %v698_v38 = vor.u32 %v870_v35, %v697_v34  ;;  %v702_v39 = vor.u32 %v869_v36, %v699_v37  ;;  %v705_v40 = vld [vmem:[%s1232_s0 + $0x40] sm:$0xf]  ;;  %v872_v41 = vld [vmem:[%s1232_s0 + $0x44] sm:$0xf0]  ;;  %v871_v42 = vld [vmem:[%s1232_s0 + $0x44] sm:$0xf] }
  0x11   :  { %v707_v43 = vld [vmem:[%s1232_s0 + $0x48] sm:$0xf0]  ;;  %v706_v44 = vor.u32 %v872_v41, %v705_v40  ;;  %v902_v46 = vld [vmem:[%s1235_s3 + $0x38] sm:$0xff]  ;;  %v713_v47 = vld [vmem:[%s1232_s0 + $0x50] sm:$0xf] }
  0x12   :  { %273 = vmatpush.bf16.msra.mxu0 %v883_v6  ;;  %v710_v45 = vor.u32 %v871_v42, %v707_v43  ;;  %460 = vmatpush.bf16.msra.mxu2 %v902_v46  ;;  %v874_v48 = vld [vmem:[%s1232_s0 + $0x54] sm:$0xf0]  ;;  %v873_v49 = vld [vmem:[%s1232_s0 + $0x54] sm:$0xf]  ;;  %v715_v50 = vld [vmem:[%s1232_s0 + $0x58] sm:$0xf0] }
  0x13   :  { %322 = vmatpush.bf16.msra.mxu1 %v891_v7  ;;  %v714_v51 = vor.u32 %v874_v48, %v713_v47  ;;  %v718_v52 = vor.u32 %v873_v49, %v715_v50  ;;  %v901_v53 = vld [vmem:[%s1235_s3 + $0x30] sm:$0xff]  ;;  %v900_v54 = vld [vmem:[%s1235_s3 + $0x28] sm:$0xff]  ;;  %v899_v55 = vld [vmem:[%s1235_s3 + $0x20] sm:$0xff] }
  0x14   :  { %v721_v56 = vld [vmem:[%s1232_s0 + $0x60] sm:$0xf]  ;;  %v876_v57 = vld [vmem:[%s1232_s0 + $0x64] sm:$0xf0]  ;;  %v875_v58 = vld [vmem:[%s1232_s0 + $0x64] sm:$0xf] }
  0x15   :  { %v723_v59 = vld [vmem:[%s1232_s0 + $0x68] sm:$0xf0]  ;;  %v722_v60 = vor.u32 %v876_v57, %v721_v56  ;;  %v898_v62 = vld [vmem:[%s1235_s3 + $0x18] sm:$0xff]  ;;  %v897_v63 = vld [vmem:[%s1235_s3 + $0x10] sm:$0xff] }
  0x16   :  { %274 = vmatpush.bf16.msra.mxu0 %v882_v8  ;;  %461 = vmatpush.bf16.msra.mxu2 %v901_v53  ;;  %v726_v61 = vor.u32 %v875_v58, %v723_v59  ;;  %v896_v0 = vld [vmem:[%s1235_s3 + $0x8] sm:$0xff]  ;;  %v729_v1 = vld [vmem:[%s1232_s0 + $0x70] sm:$0xf]  ;;  %v878_v2 = vld [vmem:[%s1232_s0 + $0x74] sm:$0xf0] }
  0x17   :  { %323 = vmatpush.bf16.msra.mxu1 %v890_v9  ;;  %v877_v3 = vld [vmem:[%s1232_s0 + $0x74] sm:$0xf]  ;;  %v731_v4 = vld [vmem:[%s1232_s0 + $0x78] sm:$0xf0]  ;;  %v895_v5 = vld [vmem:[%s1235_s3] sm:$0xff]  ;;  %v730_v6 = vor.u32 %v878_v2, %v729_v1 }
  0x18   :  { %v734_v7 = vor.u32 %v877_v3, %v731_v4 }
  0x1a   :  { %275 = vmatpush.bf16.msra.mxu0 %v881_v10  ;;  %462 = vmatpush.bf16.msra.mxu2 %v900_v54  ;;  %v1160_v10 = vld [vmem:[%s1234_s2] ss:$0 sm:$0xff] }
  0x1b   :  { %324 = vmatpush.bf16.msra.mxu1 %v889_v11 }
  0x1e   :  { %276 = vmatpush.bf16.msra.mxu0 %v880_v12  ;;  %463 = vmatpush.bf16.msra.mxu2 %v899_v55 }
  0x1f   :  { %325 = vmatpush.bf16.msra.mxu1 %v888_v13 }
  0x22   :  { %277 = vmatpush.bf16.msra.mxu0 %v879_v14  ;;  %464 = vmatpush.bf16.msra.mxu2 %v898_v62 }
  0x23   :  { %326 = vmatpush.bf16.msra.mxu1 %v887_v15 }
  0x25   :  { %278 = vmatmul.bf16.vlgmr.msra.gmra.mxu0 %v674_v20 }
  0x26   :  { %327 = vmatmul.bf16.vlgmr.msra.gmra.mxu1 %v678_v21  ;;  %465 = vmatpush.bf16.msra.mxu2 %v897_v63 }
  0x2a   :  { %466 = vmatpush.bf16.msra.mxu2 %v896_v0 }
  0x2e   :  { %467 = vmatpush.bf16.msra.mxu2 %v895_v5 }
  0x35   :  { %283 = vmatmul.bf16.gmra.mxu0 %v682_v26 }
  0x36   :  { %332 = vmatmul.bf16.gmra.mxu1 %v686_v27 }
  0x45   :  { %288 = vmatmul.bf16.gmra.mxu0 %v690_v32 }
  0x46   :  { %337 = vmatmul.bf16.gmra.mxu1 %v694_v33 }
  0x55   :  { %293 = vmatmul.bf16.gmra.mxu0 %v698_v38 }
  0x56   :  { %342 = vmatmul.bf16.gmra.mxu1 %v702_v39 }
  0x65   :  { %298 = vmatmul.bf16.gmra.mxu0 %v706_v44 }
  0x66   :  { %347 = vmatmul.bf16.gmra.mxu1 %v710_v45 }
  0x75   :  { %303 = vmatmul.bf16.gmra.mxu0 %v714_v51 }
  0x76   :  { %352 = vmatmul.bf16.gmra.mxu1 %v718_v52 }
  0x85   :  { %308 = vmatmul.bf16.gmra.mxu0 %v722_v60 }
  0x86   :  { %357 = vmatmul.bf16.gmra.mxu1 %v726_v61 }
  0x95   :  { %313 = vmatmul.bf16.gmra.mxu0 %v730_v6 }
  0x96   :  { %362 = vmatmul.bf16.gmra.mxu1 %v734_v7 }
  0xa2   :  { %v279_v8 = vpop.f32.mrf.mxu0 }
  0xa3   :  { %v328_v9 = vpop.f32.mrf.mxu1  ;;  %v280_v11 = vadd.f32 %v1160_v10, %v279_v8 }
  0xa5   :  { %v329_v14 = vadd.f32 %v328_v9, %v280_v11 }
  0xa7   :  { %v368_v17 = vmax.f32 %v329_v14, 0.0  ;;  %v910_v14 = vld [vmem:[#allocation2 + $0x38] sm:$0xff] }
  0xa8   :  { %601 = vmatpush.bf16.msra.mxu3 %v910_v14 }
  0xaa   :  { %v281_v12 = vpop.f32.mrf.mxu0 }
  0xab   :  { %v330_v13 = vpop.f32.mrf.mxu1  ;;  %v282_v15 = vadd.f32 %v1160_v10, %v281_v12 }
  0xad   :  { %v331_v16 = vadd.f32 %v330_v13, %v282_v15  ;;  %v909_v15 = vld [vmem:[#allocation2 + $0x30] sm:$0xff] }
  0xae   :  { %602 = vmatpush.bf16.msra.mxu3 %v909_v15 }
  0xaf   :  { %v369_v18 = vmax.f32 %v331_v16, 0.0 }
  0xb1   :  { %v384_v19 = vpack.c.bf16 %v369_v18, %v368_v17  ;;  %v908_v17 = vld [vmem:[#allocation2 + $0x28] sm:$0xff] }
  0xb2   :  { %v284_v20 = vpop.f32.mrf.mxu0  ;;  %603 = vmatpush.bf16.msra.mxu3 %v908_v17 }
  0xb3   :  { %v333_v21 = vpop.f32.mrf.mxu1  ;;  %468 = vmatmul.bf16.vlgmr.msra.gmra.mxu2 %v384_v19  ;;  %v285_v22 = vadd.f32 %v1160_v10, %v284_v20 }
  0xb5   :  { %v334_v25 = vadd.f32 %v333_v21, %v285_v22 }
  0xb7   :  { %v370_v28 = vmax.f32 %v334_v25, 0.0 }
  0xba   :  { %v286_v23 = vpop.f32.mrf.mxu0 }
  0xbb   :  { %v335_v24 = vpop.f32.mrf.mxu1  ;;  %v287_v26 = vadd.f32 %v1160_v10, %v286_v23  ;;  %v907_v23 = vld [vmem:[#allocation2 + $0x20] sm:$0xff] }
  0xbc   :  { %604 = vmatpush.bf16.msra.mxu3 %v907_v23 }
  0xbd   :  { %v336_v27 = vadd.f32 %v335_v24, %v287_v26 }
  0xbf   :  { %v371_v29 = vmax.f32 %v336_v27, 0.0 }
  0xc1   :  { %v385_v30 = vpack.c.bf16 %v371_v29, %v370_v28  ;;  %v906_v29 = vld [vmem:[#allocation2 + $0x18] sm:$0xff] }
  0xc2   :  { %v289_v31 = vpop.f32.mrf.mxu0  ;;  %605 = vmatpush.bf16.msra.mxu3 %v906_v29 }
  0xc3   :  { %v338_v32 = vpop.f32.mrf.mxu1  ;;  %473 = vmatmul.bf16.gmra.mxu2 %v385_v30  ;;  %v290_v33 = vadd.f32 %v1160_v10, %v289_v31  ;;  %v905_v31 = vld [vmem:[#allocation2 + $0x10] sm:$0xff] }
  0xc5   :  { %v339_v36 = vadd.f32 %v338_v32, %v290_v33 }
  0xc6   :  { %606 = vmatpush.bf16.msra.mxu3 %v905_v31 }
  0xc7   :  { %v372_v39 = vmax.f32 %v339_v36, 0.0  ;;  %v904_v36 = vld [vmem:[#allocation2 + $0x8] sm:$0xff] }
  0xca   :  { %v291_v34 = vpop.f32.mrf.mxu0  ;;  %607 = vmatpush.bf16.msra.mxu3 %v904_v36 }
  0xcb   :  { %v340_v35 = vpop.f32.mrf.mxu1  ;;  %v292_v37 = vadd.f32 %v1160_v10, %v291_v34 }
  0xcd   :  { %v341_v38 = vadd.f32 %v340_v35, %v292_v37 }
  0xcf   :  { %v373_v40 = vmax.f32 %v341_v38, 0.0 }
  0xd1   :  { %v386_v41 = vpack.c.bf16 %v373_v40, %v372_v39  ;;  %v903_v40 = vld [vmem:[#allocation2] sm:$0xff] }
  0xd2   :  { %v294_v42 = vpop.f32.mrf.mxu0  ;;  %608 = vmatpush.bf16.msra.mxu3 %v903_v40 }
  0xd3   :  { %v343_v43 = vpop.f32.mrf.mxu1  ;;  %478 = vmatmul.bf16.gmra.mxu2 %v386_v41  ;;  %v295_v44 = vadd.f32 %v1160_v10, %v294_v42 }
  0xd5   :  { %v344_v47 = vadd.f32 %v343_v43, %v295_v44  ;;  %v915_v43 = vld [vmem:[%s1236_s4] ss:$0 sm:$0xff] }
  0xd7   :  { %v374_v50 = vmax.f32 %v344_v47, 0.0 }
  0xda   :  { %v296_v45 = vpop.f32.mrf.mxu0 }
  0xdb   :  { %v345_v46 = vpop.f32.mrf.mxu1  ;;  %v297_v48 = vadd.f32 %v1160_v10, %v296_v45 }
  0xdd   :  { %v346_v49 = vadd.f32 %v345_v46, %v297_v48 }
  0xdf   :  { %v375_v51 = vmax.f32 %v346_v49, 0.0 }
  0xe1   :  { %v387_v52 = vpack.c.bf16 %v375_v51, %v374_v50 }
  0xe2   :  { %v299_v53 = vpop.f32.mrf.mxu0 }
  0xe3   :  { %v348_v54 = vpop.f32.mrf.mxu1  ;;  %483 = vmatmul.bf16.gmra.mxu2 %v387_v52  ;;  %v300_v55 = vadd.f32 %v1160_v10, %v299_v53 }
  0xe5   :  { %v349_v58 = vadd.f32 %v348_v54, %v300_v55 }
  0xe7   :  { %v376_v61 = vmax.f32 %v349_v58, 0.0 }
  0xea   :  { %v301_v56 = vpop.f32.mrf.mxu0 }
  0xeb   :  { %v350_v57 = vpop.f32.mrf.mxu1  ;;  %v302_v59 = vadd.f32 %v1160_v10, %v301_v56 }
  0xed   :  { %v351_v60 = vadd.f32 %v350_v57, %v302_v59 }
  0xef   :  { %v377_v62 = vmax.f32 %v351_v60, 0.0 }
  0xf1   :  { %v388_v63 = vpack.c.bf16 %v377_v62, %v376_v61 }
  0xf2   :  { %v304_v0 = vpop.f32.mrf.mxu0 }
  0xf3   :  { %v353_v1 = vpop.f32.mrf.mxu1  ;;  %488 = vmatmul.bf16.gmra.mxu2 %v388_v63  ;;  %v305_v2 = vadd.f32 %v1160_v10, %v304_v0 }
  0xf5   :  { %v354_v5 = vadd.f32 %v353_v1, %v305_v2 }
  0xf7   :  { %v378_v8 = vmax.f32 %v354_v5, 0.0 }
  0xfa   :  { %v306_v3 = vpop.f32.mrf.mxu0 }
  0xfb   :  { %v355_v4 = vpop.f32.mrf.mxu1  ;;  %v307_v6 = vadd.f32 %v1160_v10, %v306_v3 }
  0xfd   :  { %v356_v7 = vadd.f32 %v355_v4, %v307_v6 }
  0xff   :  { %v379_v9 = vmax.f32 %v356_v7, 0.0 }
 0x101   :  { %v389_v11 = vpack.c.bf16 %v379_v9, %v378_v8 }
 0x102   :  { %v309_v12 = vpop.f32.mrf.mxu0 }
 0x103   :  { %v358_v13 = vpop.f32.mrf.mxu1  ;;  %493 = vmatmul.bf16.gmra.mxu2 %v389_v11  ;;  %v310_v16 = vadd.f32 %v1160_v10, %v309_v12 }
 0x105   :  { %v359_v20 = vadd.f32 %v358_v13, %v310_v16 }
 0x107   :  { %v380_v24 = vmax.f32 %v359_v20, 0.0 }
 0x10a   :  { %v311_v18 = vpop.f32.mrf.mxu0 }
 0x10b   :  { %v360_v19 = vpop.f32.mrf.mxu1  ;;  %v312_v21 = vadd.f32 %v1160_v10, %v311_v18 }
 0x10d   :  { %v361_v22 = vadd.f32 %v360_v19, %v312_v21 }
 0x10f   :  { %v381_v25 = vmax.f32 %v361_v22, 0.0 }
 0x111   :  { %v390_v26 = vpack.c.bf16 %v381_v25, %v380_v24 }
 0x112   :  { %v314_v27 = vpop.f32.mrf.mxu0 }
 0x113   :  { %v363_v28 = vpop.f32.mrf.mxu1  ;;  %498 = vmatmul.bf16.gmra.mxu2 %v390_v26  ;;  %v315_v30 = vadd.f32 %v1160_v10, %v314_v27 }
 0x115   :  { %v364_v33 = vadd.f32 %v363_v28, %v315_v30 }
 0x117   :  { %v382_v38 = vmax.f32 %v364_v33, 0.0 }
 0x11a   :  { %v316_v32 = vpop.f32.mrf.mxu0 }
 0x11b   :  { %v317_v34 = vadd.f32 %v1160_v10, %v316_v32  ;;  %v365_v35 = vpop.f32.mrf.mxu1 }
 0x11d   :  { %v366_v37 = vadd.f32 %v365_v35, %v317_v34  ;;  %v916_v35 = vld [vmem:[%s1238_s6] ss:$0 sm:$0xff] }
 0x11f   :  { %v383_v39 = vmax.f32 %v366_v37, 0.0 }
 0x121   :  { %v391_v41 = vpack.c.bf16 %v383_v39, %v382_v38 }
 0x123   :  { %503 = vmatmul.bf16.gmra.mxu2 %v391_v41 }
 0x136   :  { %v469_v42 = vpop.f32.mrf.mxu2 }
 0x137   :  { %v470_v44 = vadd.f32 %v915_v43, %v469_v42 }
 0x139   :  { %v509_v47 = vmax.f32 %v470_v44, 0.0 }
 0x13e   :  { %v471_v45 = vpop.f32.mrf.mxu2 }
 0x13f   :  { %v472_v46 = vadd.f32 %v915_v43, %v471_v45 }
 0x141   :  { %v510_v10 = vmax.f32 %v472_v46, 0.0 }
 0x143   :  { %v525_v48 = vpack.c.bf16 %v510_v10, %v509_v47 }
 0x145   :  { %609 = vmatmul.bf16.vlgmr.msra.gmra.mxu3 %v525_v48 }
 0x146   :  { %v474_v49 = vpop.f32.mrf.mxu2 }
 0x147   :  { %v475_v50 = vadd.f32 %v915_v43, %v474_v49 }
 0x149   :  { %v511_v53 = vmax.f32 %v475_v50, 0.0 }
 0x14e   :  { %v476_v51 = vpop.f32.mrf.mxu2 }
 0x14f   :  { %v477_v52 = vadd.f32 %v915_v43, %v476_v51 }
 0x151   :  { %v512_v54 = vmax.f32 %v477_v52, 0.0 }
 0x153   :  { %v526_v55 = vpack.c.bf16 %v512_v54, %v511_v53 }
 0x155   :  { %614 = vmatmul.bf16.gmra.mxu3 %v526_v55 }
 0x156   :  { %v479_v56 = vpop.f32.mrf.mxu2 }
 0x157   :  { %v480_v57 = vadd.f32 %v915_v43, %v479_v56 }
 0x159   :  { %v513_v60 = vmax.f32 %v480_v57, 0.0 }
 0x15e   :  { %v481_v58 = vpop.f32.mrf.mxu2 }
 0x15f   :  { %v482_v59 = vadd.f32 %v915_v43, %v481_v58 }
 0x161   :  { %v514_v61 = vmax.f32 %v482_v59, 0.0 }
 0x163   :  { %v527_v62 = vpack.c.bf16 %v514_v61, %v513_v60 }
 0x165   :  { %619 = vmatmul.bf16.gmra.mxu3 %v527_v62 }
 0x166   :  { %v484_v63 = vpop.f32.mrf.mxu2 }
 0x167   :  { %v485_v0 = vadd.f32 %v915_v43, %v484_v63 }
 0x169   :  { %v515_v3 = vmax.f32 %v485_v0, 0.0 }
 0x16e   :  { %v486_v1 = vpop.f32.mrf.mxu2 }
 0x16f   :  { %v487_v2 = vadd.f32 %v915_v43, %v486_v1 }
 0x171   :  { %v516_v4 = vmax.f32 %v487_v2, 0.0 }
 0x173   :  { %v528_v5 = vpack.c.bf16 %v516_v4, %v515_v3 }
 0x175   :  { %624 = vmatmul.bf16.gmra.mxu3 %v528_v5 }
 0x176   :  { %v489_v6 = vpop.f32.mrf.mxu2 }
 0x177   :  { %v490_v7 = vadd.f32 %v915_v43, %v489_v6 }
 0x179   :  { %v517_v11 = vmax.f32 %v490_v7, 0.0 }
 0x17e   :  { %v491_v8 = vpop.f32.mrf.mxu2 }
 0x17f   :  { %v492_v9 = vadd.f32 %v915_v43, %v491_v8 }
 0x181   :  { %v518_v12 = vmax.f32 %v492_v9, 0.0 }
 0x183   :  { %v529_v13 = vpack.c.bf16 %v518_v12, %v517_v11 }
 0x185   :  { %629 = vmatmul.bf16.gmra.mxu3 %v529_v13 }
 0x186   :  { %v494_v14 = vpop.f32.mrf.mxu2 }
 0x187   :  { %v495_v15 = vadd.f32 %v915_v43, %v494_v14 }
 0x189   :  { %v519_v18 = vmax.f32 %v495_v15, 0.0 }
 0x18e   :  { %v496_v16 = vpop.f32.mrf.mxu2 }
 0x18f   :  { %v497_v17 = vadd.f32 %v915_v43, %v496_v16 }
 0x191   :  { %v520_v19 = vmax.f32 %v497_v17, 0.0 }
 0x193   :  { %v530_v20 = vpack.c.bf16 %v520_v19, %v519_v18 }
 0x195   :  { %634 = vmatmul.bf16.gmra.mxu3 %v530_v20 }
 0x196   :  { %v499_v21 = vpop.f32.mrf.mxu2 }
 0x197   :  { %v500_v22 = vadd.f32 %v915_v43, %v499_v21 }
 0x199   :  { %v521_v25 = vmax.f32 %v500_v22, 0.0 }
 0x19e   :  { %v501_v23 = vpop.f32.mrf.mxu2 }
 0x19f   :  { %v502_v24 = vadd.f32 %v915_v43, %v501_v23 }
 0x1a1   :  { %v522_v26 = vmax.f32 %v502_v24, 0.0 }
 0x1a3   :  { %v531_v27 = vpack.c.bf16 %v522_v26, %v521_v25 }
 0x1a5   :  { %639 = vmatmul.bf16.gmra.mxu3 %v531_v27 }
 0x1a6   :  { %v504_v28 = vpop.f32.mrf.mxu2 }
 0x1a7   :  { %v505_v29 = vadd.f32 %v915_v43, %v504_v28 }
 0x1a9   :  { %v523_v32 = vmax.f32 %v505_v29, 0.0 }
 0x1ae   :  { %v506_v30 = vpop.f32.mrf.mxu2 }
 0x1af   :  { %v507_v31 = vadd.f32 %v915_v43, %v506_v30 }
 0x1b1   :  { %v524_v33 = vmax.f32 %v507_v31, 0.0 }
 0x1b3   :  { %v532_v34 = vpack.c.bf16 %v524_v33, %v523_v32 }
 0x1b5   :  { %644 = vmatmul.bf16.gmra.mxu3 %v532_v34 }
 0x1c8   :  { %v610_v36 = vpop.f32.mrf.mxu3 }
 0x1c9   :  { %v611_v37 = vadd.f32 %v916_v35, %v610_v36 }
 0x1cb   :  { %650 = vst [vmem:[%s1239_s7] sm:$0xff] %v611_v37 }
 0x1d0   :  { %v612_v38 = vpop.f32.mrf.mxu3 }
 0x1d1   :  { %v613_v39 = vadd.f32 %v916_v35, %v612_v38 }
 0x1d3   :  { %651 = vst [vmem:[%s1239_s7 + $0x8] sm:$0xff] %v613_v39 }
 0x1d8   :  { %v615_v40 = vpop.f32.mrf.mxu3 }
 0x1d9   :  { %v616_v41 = vadd.f32 %v916_v35, %v615_v40 }
 0x1db   :  { %652 = vst [vmem:[%s1239_s7 + $0x10] sm:$0xff] %v616_v41 }
 0x1e0   :  { %v617_v42 = vpop.f32.mrf.mxu3 }
 0x1e1   :  { %v618_v43 = vadd.f32 %v916_v35, %v617_v42 }
 0x1e3   :  { %653 = vst [vmem:[%s1239_s7 + $0x18] sm:$0xff] %v618_v43 }
 0x1e8   :  { %v620_v44 = vpop.f32.mrf.mxu3 }
 0x1e9   :  { %v621_v45 = vadd.f32 %v916_v35, %v620_v44 }
 0x1eb   :  { %654 = vst [vmem:[%s1239_s7 + $0x20] sm:$0xff] %v621_v45 }
 0x1f0   :  { %v622_v46 = vpop.f32.mrf.mxu3 }
 0x1f1   :  { %v623_v47 = vadd.f32 %v916_v35, %v622_v46 }
 0x1f3   :  { %655 = vst [vmem:[%s1239_s7 + $0x28] sm:$0xff] %v623_v47 }
 0x1f8   :  { %v625_v10 = vpop.f32.mrf.mxu3 }
 0x1f9   :  { %v626_v48 = vadd.f32 %v916_v35, %v625_v10 }
 0x1fb   :  { %656 = vst [vmem:[%s1239_s7 + $0x30] sm:$0xff] %v626_v48 }
 0x200   :  { %v627_v49 = vpop.f32.mrf.mxu3 }
 0x201   :  { %v628_v50 = vadd.f32 %v916_v35, %v627_v49 }
 0x203   :  { %657 = vst [vmem:[%s1239_s7 + $0x38] sm:$0xff] %v628_v50 }
 0x208   :  { %v630_v51 = vpop.f32.mrf.mxu3 }
 0x209   :  { %v631_v52 = vadd.f32 %v916_v35, %v630_v51 }
 0x20b   :  { %658 = vst [vmem:[%s1239_s7 + $0x40] sm:$0xff] %v631_v52 }
 0x210   :  { %v632_v53 = vpop.f32.mrf.mxu3 }
 0x211   :  { %v633_v54 = vadd.f32 %v916_v35, %v632_v53 }
 0x213   :  { %659 = vst [vmem:[%s1239_s7 + $0x48] sm:$0xff] %v633_v54 }
 0x218   :  { %v635_v55 = vpop.f32.mrf.mxu3 }
 0x219   :  { %v636_v56 = vadd.f32 %v916_v35, %v635_v55 }
 0x21b   :  { %660 = vst [vmem:[%s1239_s7 + $0x50] sm:$0xff] %v636_v56 }
 0x220   :  { %v637_v57 = vpop.f32.mrf.mxu3 }
 0x221   :  { %v638_v58 = vadd.f32 %v916_v35, %v637_v57 }
 0x223   :  { %661 = vst [vmem:[%s1239_s7 + $0x58] sm:$0xff] %v638_v58 }
 0x228   :  { %v640_v59 = vpop.f32.mrf.mxu3 }
 0x229   :  { %v641_v60 = vadd.f32 %v916_v35, %v640_v59 }
 0x22b   :  { %662 = vst [vmem:[%s1239_s7 + $0x60] sm:$0xff] %v641_v60 }
 0x230   :  { %v642_v61 = vpop.f32.mrf.mxu3 }
 0x231   :  { %v643_v62 = vadd.f32 %v916_v35, %v642_v61 }
 0x233   :  { %663 = vst [vmem:[%s1239_s7 + $0x68] sm:$0xff] %v643_v62 }
 0x238   :  { %v645_v63 = vpop.f32.mrf.mxu3 }
 0x239   :  { %v646_v0 = vadd.f32 %v916_v35, %v645_v63 }
 0x23b   :  { %664 = vst [vmem:[%s1239_s7 + $0x70] sm:$0xff] %v646_v0 }
 0x240   :  { %v647_v1 = vpop.f32.mrf.mxu3 }
 0x241   :  { %v648_v2 = vadd.f32 %v916_v35, %v647_v1 }
 0x243   :  { %665 = vst [vmem:[%s1239_s7 + $0x78] sm:$0xff] %v648_v2 }
 0x244   :  { %670 = vsyncpa [#allocation3], 1 }

</bundles_post_ra>
